<compile_context>
chip_gen: v7x
topology: tpu7x:2x2x1
jax: 0.10.0
libtpu: 0.0.40
codegen_flags: <defaults>
</compile_context>

<pallas_src>
import functools
import math

import jax
import jax.numpy as jnp
from jax.experimental import pallas as pl
from jax.experimental.pallas import tpu as pltpu


def _round_up(x, m):
    return (x + m - 1) // m * m


def _device_kind():
    try:
        return jax.devices()[0].device_kind.lower()
    except Exception:
        return ""


def _vmem_limit_bytes():
    # v7x: 64 MiB physical VMEM per TensorCore -> leave headroom for compiler
    # internal scratch.  v5e/v6e: 128 MiB physical -> 64 MiB scoped is safe.
    return (48 << 20) if "v7" in _device_kind() else (64 << 20)


def _num_tensorcores():
    # v5e/v6e have 1 TensorCore per chip; v7x has 2.
    return 2 if "v7" in _device_kind() else 1


# ----------------------------------------------------------------------------
# Fused layer kernel: out = act( A @ (X @ W^T) ), tiled over (rows of A, K).
#   adj_ref : [tm, tk]  int8   (cast to bf16 just before the MXU)
#   x_ref   : [tk, d_in] bf16  (K-indexed tile of the layer input)
#   wt_ref  : [d_in, d_out] bf16 (pre-transposed weight, VMEM-resident)
#   out_ref : [tm, d_out] f32  (revisited across K -> used as the accumulator)
# ----------------------------------------------------------------------------
def _gnn_layer_kernel(adj_ref, x_ref, wt_ref, out_ref, *, activation, valid_cols):
    k = pl.program_id(1)

    @pl.when(k == 0)
    def _():
        out_ref[...] = jnp.zeros_like(out_ref)

    # On-the-fly linear for this K tile (bf16 MXU operands, f32 accumulate).
    xw = jnp.dot(x_ref[...], wt_ref[...], preferred_element_type=jnp.float32)
    # Propagation: accumulate A[i, k] @ XW_k into the resident f32 output.
    out_ref[...] += jnp.dot(
        adj_ref[...].astype(jnp.bfloat16),
        xw.astype(jnp.bfloat16),
        preferred_element_type=jnp.float32,
    )

    @pl.when(k == pl.num_programs(1) - 1)
    def _():
        z = out_ref[...]
        if activation == "relu":
            out_ref[...] = jnp.maximum(z, 0.0)
        elif activation == "log_softmax":
            # Mask padded feature columns so they don't shift max / logsumexp.
            col = jax.lax.broadcasted_iota(jnp.int32, z.shape, 1)
            zm = jnp.where(col < valid_cols, z, -jnp.inf)
            m = jnp.max(zm, axis=-1, keepdims=True)
            lse = jnp.log(jnp.sum(jnp.exp(zm - m), axis=-1, keepdims=True)) + m
            out_ref[...] = z - lse
        else:
            out_ref[...] = z


def _gnn_layer(adj_i8, x_bf16, wt_bf16, *, tm, tk, activation, valid_cols):
    n_pad = adj_i8.shape[0]
    d_in = x_bf16.shape[1]
    d_out = wt_bf16.shape[1]
    row_tiles = n_pad // tm

    kernel = functools.partial(
        _gnn_layer_kernel, activation=activation, valid_cols=valid_cols
    )

    flops = 2 * n_pad * n_pad * d_out + 2 * row_tiles * n_pad * d_in * d_out
    bytes_accessed = (
        n_pad * n_pad * 1                 # adjacency stream, int8, read once
        + row_tiles * n_pad * d_in * 2    # X tiles re-read once per row tile (bf16)
        + d_in * d_out * 2                # resident weight
        + n_pad * d_out * 4               # f32 output
    )

    return pl.pallas_call(
        kernel,
        out_shape=jax.ShapeDtypeStruct((n_pad, d_out), jnp.float32),
        grid_spec=pltpu.PrefetchScalarGridSpec(
            num_scalar_prefetch=0,
            grid=(row_tiles, n_pad // tk),
            in_specs=[
                pl.BlockSpec((tm, tk), lambda i, k: (i, k)),       # adjacency tile
                pl.BlockSpec((tk, d_in), lambda i, k: (k, 0)),     # X tile for K step
                pl.BlockSpec((d_in, d_out), lambda i, k: (0, 0)),  # resident W^T
            ],
            out_specs=pl.BlockSpec((tm, d_out), lambda i, k: (i, 0)),
        ),
        compiler_params=pltpu.CompilerParams(
            dimension_semantics=("parallel", "arbitrary"),
            vmem_limit_bytes=_vmem_limit_bytes(),
        ),
        cost_estimate=pl.CostEstimate(
            flops=flops,
            transcendentals=(n_pad * d_out if activation == "log_softmax" else 0),
            bytes_accessed=bytes_accessed,
        ),
    )(adj_i8, x_bf16, wt_bf16)


# ----------------------------------------------------------------------------
# Forward pass wrapper
# ----------------------------------------------------------------------------
def vanilla_gnn_forward(x, adjacency, w0, w1, *, tile_m=1024, tile_k=2048):
    """x: [N, dim_in], adjacency: [N, N] (dense, 0/1 + self-loops),
    w0: [dim_h, dim_in], w1: [dim_out, dim_h] (PyTorch nn.Linear layout)."""
    n, dim_in = x.shape
    dim_h = w0.shape[0]
    dim_out = w1.shape[0]

    # Node dim padded to a multiple of both tiles; feature dims to 128.
    n_pad = _round_up(n, 128)
    tm = min(tile_m, n_pad)          # multiples of 128 by construction
    tk = min(tile_k, n_pad)
    lcm = tm * tk // math.gcd(tm, tk)
    n_pad = _round_up(n_pad, lcm)

    # v7x megacore: prefer an even number of row tiles so both TensorCores
    # stay busy; shrink tm (keeping it a multiple of 128) rather than padding.
    if _num_tensorcores() > 1:
        while tm > 128 and (tm // 2) % 128 == 0 and (n_pad // tm) % 2 != 0:
            tm //= 2

    d_in_pad = _round_up(dim_in, 128)
    d_h_pad = _round_up(dim_h, 128)
    d_out_pad = _round_up(dim_out, 128)

    # bf16 activations / pre-transposed bf16 weights (MXU-native operands).
    x_pad = (
        jnp.zeros((n_pad, d_in_pad), jnp.bfloat16)
        .at[:n, :dim_in].set(x.astype(jnp.bfloat16))
    )
    wt0 = (
        jnp.zeros((d_in_pad, d_h_pad), jnp.bfloat16)
        .at[:dim_in, :dim_h].set(w0.T.astype(jnp.bfloat16))
    )
    wt1 = (
        jnp.zeros((d_h_pad, d_out_pad), jnp.bfloat16)
        .at[:dim_h, :dim_out].set(w1.T.astype(jnp.bfloat16))
    )
    # Adjacency streamed as int8 (exact for small-integer 0/1/2 entries).
    adj_pad = (
        jnp.zeros((n_pad, n_pad), jnp.int8)
        .at[:n, :n].set(adjacency.astype(jnp.int8))
    )

    # Layer 0: fused linear + propagation + ReLU (f32 out, cast once to bf16).
    h = _gnn_layer(adj_pad, x_pad, wt0, tm=tm, tk=tk,
                   activation="relu", valid_cols=d_h_pad)

    # Layer 1 (last): fused linear + propagation + masked log_softmax.
    out_pad = _gnn_layer(adj_pad, h.astype(jnp.bfloat16), wt1, tm=tm, tk=tk,
                         activation="log_softmax", valid_cols=dim_out)

    return out_pad[:n, :dim_out]


def init_linear_weight(key, out_features, in_features):
    # torch.nn.Linear default init: U(-1/sqrt(fan_in), 1/sqrt(fan_in)).
    bound = 1.0 / jnp.sqrt(jnp.float32(in_features))
    return jax.random.uniform(
        key, (out_features, in_features), dtype=jnp.float32,
        minval=-bound, maxval=bound,
    )


if __name__ == "__main__":
    # Small, module-consistent shapes: N nodes with dim_in features each.
    N, DIM_IN, DIM_H, DIM_OUT = 16, 8, 32, 4

    key = jax.random.PRNGKey(0)
    k_x, k_adj, k_w0, k_w1 = jax.random.split(key, 4)

    x = jax.random.normal(k_x, (N, DIM_IN), dtype=jnp.float32)

    # Dense adjacency with self-loops (as create_adjacency would produce).
    adj = (jax.random.uniform(k_adj, (N, N)) > 0.7).astype(jnp.float32)
    adj = adj + jnp.eye(N, dtype=jnp.float32)

    w0 = init_linear_weight(k_w0, DIM_H, DIM_IN)    # layers[0].linear.weight
    w1 = init_linear_weight(k_w1, DIM_OUT, DIM_H)   # layers[-1].linear.weight

    out = vanilla_gnn_forward(x, adj, w0, w1)
    out = jax.block_until_ready(out)
    assert out.shape == (N, DIM_OUT)

    # (1) Semantic check vs. the pure-f32 reference.  The kernel runs bf16
    #     MXU operands (per perf review), so the tolerance is loose.
    h_ref = jnp.maximum(adj @ (x @ w0.T), 0.0)
    z_ref = adj @ (h_ref @ w1.T)
    ref_f32 = jax.nn.log_softmax(z_ref, axis=1)
    err_f32 = float(jnp.max(jnp.abs(out - ref_f32)))
    assert err_f32 < 2.5e-1, err_f32

    # (2) Tighter check vs. a reference that applies the same bf16 roundings.
    def _matched_layer(a, xb, w):
        wt = w.T.astype(jnp.bfloat16)
        xw = jnp.dot(xb, wt, preferred_element_type=jnp.float32)
        return jnp.dot(a.astype(jnp.bfloat16), xw.astype(jnp.bfloat16),
                       preferred_element_type=jnp.float32)

    h_m = jnp.maximum(_matched_layer(adj, x.astype(jnp.bfloat16), w0), 0.0)
    z_m = _matched_layer(adj, h_m.astype(jnp.bfloat16), w1)
    ref_m = jax.nn.log_softmax(z_m, axis=1)
    err_m = float(jnp.max(jnp.abs(out - ref_m)))
    assert err_m < 5e-2, err_m

    print("KERNEL_OK")
</pallas_src>

<mosaic_0001>
module attributes {stable_mosaic.version = 11 : i64} {
  func.func @_gnn_layer_kernel(%arg0: i32, %arg1: i32, %arg2: memref<128x128xi8, #tpu.memory_space<vmem>>, %arg3: memref<128x128xbf16, #tpu.memory_space<vmem>>, %arg4: memref<128x128xbf16, #tpu.memory_space<vmem>>, %arg5: memref<128x128xf32, #tpu.memory_space<vmem>>) attributes {dimension_semantics = [#tpu.dimension_semantics<parallel>, #tpu.dimension_semantics<arbitrary>], iteration_bounds = array<i64: 1, 1>, scalar_prefetch = 0 : i64, scratch_operands = 0 : i64, tpu.core_type = #tpu.core_type<tc>, window_params = [{transform_indices = @transform_0, window_bounds = array<i64: 128, 128>}, {transform_indices = @transform_1, window_bounds = array<i64: 128, 128>}, {pipeline_mode = #tpu.pipeline_mode<synchronous>, transform_indices = @transform_2, window_bounds = array<i64: 128, 128>}, {transform_indices = @transform_3, window_bounds = array<i64: 128, 128>}]} {
    %c0_i32 = arith.constant 0 : i32
    %0 = arith.cmpi eq, %arg1, %c0_i32 : i32
    %1 = arith.extui %0 : i1 to i32
    %c0_i32_0 = arith.constant 0 : i32
    %2 = arith.cmpi ne, %1, %c0_i32_0 : i32
    scf.if %2 {
      %cst_13 = arith.constant 0.000000e+00 : f32
      %16 = vector.broadcast %cst_13 : f32 to vector<128x128xf32>
      %c0_14 = arith.constant 0 : index
      %c0_15 = arith.constant 0 : index
      %17 = vector.load %arg5[%c0_14, %c0_15] : memref<128x128xf32, #tpu.memory_space<vmem>>, vector<128x128xf32>
      tpu.vector_store %arg5[%c0_14, %c0_15], %16 {strides = array<i32>} : memref<128x128xf32, #tpu.memory_space<vmem>>, vector<128x128xf32>,
    } else {
    }
    %c0 = arith.constant 0 : index
    %c0_1 = arith.constant 0 : index
    %3 = vector.load %arg3[%c0, %c0_1] : memref<128x128xbf16, #tpu.memory_space<vmem>>, vector<128x128xbf16>
    %c0_2 = arith.constant 0 : index
    %c0_3 = arith.constant 0 : index
    %4 = vector.load %arg4[%c0_2, %c0_3] : memref<128x128xbf16, #tpu.memory_space<vmem>>, vector<128x128xbf16>
    %cst = arith.constant dense<0.000000e+00> : vector<128x128xf32>
    %5 = tpu.matmul %3, %4, %cst {dimension_numbers = #tpu.dot_dimension_numbers<[1], [0], [0], [1], [0, 0, 1, 1], [], []>} : vector<128x128xbf16>, vector<128x128xbf16>, vector<128x128xf32> -> vector<128x128xf32>
    %c0_4 = arith.constant 0 : index
    %c0_5 = arith.constant 0 : index
    %6 = vector.load %arg5[%c0_4, %c0_5] : memref<128x128xf32, #tpu.memory_space<vmem>>, vector<128x128xf32>
    %c0_6 = arith.constant 0 : index
    %c0_7 = arith.constant 0 : index
    %7 = vector.load %arg2[%c0_6, %c0_7] : memref<128x128xi8, #tpu.memory_space<vmem>>, vector<128x128xi8>
    %8 = arith.sitofp %7 : vector<128x128xi8> to vector<128x128xbf16>
    %9 = arith.truncf %5 : vector<128x128xf32> to vector<128x128xbf16>
    %cst_8 = arith.constant dense<0.000000e+00> : vector<128x128xf32>
    %10 = tpu.matmul %8, %9, %cst_8 {dimension_numbers = #tpu.dot_dimension_numbers<[1], [0], [0], [1], [0, 0, 1, 1], [], []>} : vector<128x128xbf16>, vector<128x128xbf16>, vector<128x128xf32> -> vector<128x128xf32>
    %11 = arith.addf %6, %10 : vector<128x128xf32>
    %c0_9 = arith.constant 0 : index
    %c0_10 = arith.constant 0 : index
    %12 = vector.load %arg5[%c0_9, %c0_10] : memref<128x128xf32, #tpu.memory_space<vmem>>, vector<128x128xf32>
    tpu.vector_store %arg5[%c0_9, %c0_10], %11 {strides = array<i32>} : memref<128x128xf32, #tpu.memory_space<vmem>>, vector<128x128xf32>,
    %c0_i32_11 = arith.constant 0 : i32
    %13 = arith.cmpi eq, %arg1, %c0_i32_11 : i32
    %14 = arith.extui %13 : i1 to i32
    %c0_i32_12 = arith.constant 0 : i32
    %15 = arith.cmpi ne, %14, %c0_i32_12 : i32
    scf.if %15 {
      %c0_13 = arith.constant 0 : index
      %c0_14 = arith.constant 0 : index
      %16 = vector.load %arg5[%c0_13, %c0_14] : memref<128x128xf32, #tpu.memory_space<vmem>>, vector<128x128xf32>
      %cst_15 = arith.constant 0.000000e+00 : f32
      %17 = vector.broadcast %cst_15 : f32 to vector<128x128xf32>
      %18 = arith.maximumf %16, %17 : vector<128x128xf32>
      %c0_16 = arith.constant 0 : index
      %c0_17 = arith.constant 0 : index
      %19 = vector.load %arg5[%c0_16, %c0_17] : memref<128x128xf32, #tpu.memory_space<vmem>>, vector<128x128xf32>
      tpu.vector_store %arg5[%c0_16, %c0_17], %18 {strides = array<i32>} : memref<128x128xf32, #tpu.memory_space<vmem>>, vector<128x128xf32>,
    } else {
    }
    return
  }
  func.func @transform_0(%arg0: i32, %arg1: i32) -> (i32, i32) {
    %c0_i32 = arith.constant 0 : i32
    return %arg0, %arg1 : i32, i32
  }
  func.func @transform_1(%arg0: i32, %arg1: i32) -> (i32, i32) {
    %c0_i32 = arith.constant 0 : i32
    %c0_i32_0 = arith.constant 0 : i32
    return %arg1, %c0_i32 : i32, i32
  }
  func.func @transform_2(%arg0: i32, %arg1: i32) -> (i32, i32) {
    %c0_i32 = arith.constant 0 : i32
    %c0_i32_0 = arith.constant 0 : i32
    %c0_i32_1 = arith.constant 0 : i32
    return %c0_i32, %c0_i32_0 : i32, i32
  }
  func.func @transform_3(%arg0: i32, %arg1: i32) -> (i32, i32) {
    %c0_i32 = arith.constant 0 : i32
    %c0_i32_0 = arith.constant 0 : i32
    return %arg0, %c0_i32 : i32, i32
  }
}

</mosaic_0001>

<bundles_post_ra>
// kernel: tpu_custom_call.1
= control target key start
LH: loop header
LB: loop body
LE: loop exit
PB: predicated region body
PF: predicated region fallthrough
CT: control target
= control target key end

     0   :  { %8 = vsyncpa [#allocation3], 0  ;;  %s855_s0 = inlined_call_operand.hbm [shape: s8[128,128], index: 0, kind: input, shape index: {}]   ;;  %s856_s1 = inlined_call_operand.hbm [shape: bf16[128,128], index: 1, kind: input, shape index: {}]   ;;  %s857_s2 = inlined_call_operand.hbm [shape: bf16[128,128], index: 2, kind: input, shape index: {}]   ;;  %s858_s3 = inlined_call_operand.hbm [shape: f32[128,128], index: 3, kind: output, shape index: {}]  }
   0x1   :  { %9 = vsyncpa [#allocation6], 0 }
   0x2   :  { %10 = vsyncpa [#allocation4], 0  ;;  %s767_s12 = smov [#allocation5]   ;;  %s673_s16 = scalar_lea.hbm %s856_s1, 1024 }
   0x3   :  { %s28_s13 = sshll.u32 %s767_s12, 4  ;;  %p674_p0 = scmp.ne.s32.totalorder %s856_s1, %s673_s16  ;;  %s29_s13 = int_to_ptr.vmem [resolvable:$true] %s28_s13 }
   0x4   :  { %p677_p1 = scmp.lt.u32.totalorder %s673_s16, %s856_s1 }
   0x6   :  { %p679_p2 = pnand %p677_p1, %p674_p0 }
   0x8   :  { %682 = shalt.err (!%p679_p2)
}
   0x9   :  { %s683_s21 = scalar_lea.vmem %s29_s13, 1024  ;;  %p688_p4 = scmp.lt.s32.totalorder %s29_s13, %s29_s13 }
   0xa   :  { %p684_p3 = scmp.ne.s32.totalorder %s29_s13, %s683_s21  ;;  %p689_p5 = scmp.lt.s32.totalorder %s683_s21, %s683_s21 }
   0xc   :  { %p690_p6 = por %p689_p5, %p688_p4 }
   0xe   :  { %p691_p7 = pnand %p690_p6, %p684_p3 }
  0x10   :  { %694 = shalt.err (!%p691_p7)
}
  0x11   :  { %s768_s22 = smov 64   ;;  %s769_s23 = smov 4  }
  0x12   :  { %34 = dma.hbm_to_vmem [thread:$0]  %s856_s1, 1024, %s29_s13, [#allocation6], %s768_s22, %s768_s22, %s769_s23  }
  0x13   :  { %s770_s26 = smov [#allocation2]   ;;  %s695_s30 = scalar_lea.hbm %s855_s0, 512 }
  0x14   :  { %s16_s27 = sshll.u32 %s770_s26, 4  ;;  %p696_p8 = scmp.ne.s32.totalorder %s855_s0, %s695_s30  ;;  %s17_s27 = int_to_ptr.vmem [resolvable:$true] %s16_s27 }
  0x15   :  { %p699_p9 = scmp.lt.u32.totalorder %s695_s30, %s855_s0 }
  0x17   :  { %p701_p10 = pnand %p699_p9, %p696_p8 }
  0x19   :  { %704 = shalt.err (!%p701_p10)
}
  0x1a   :  { %s705_s8 = scalar_lea.vmem %s17_s27, 512  ;;  %p710_p12 = scmp.lt.s32.totalorder %s17_s27, %s17_s27 }
  0x1b   :  { %p706_p11 = scmp.ne.s32.totalorder %s17_s27, %s705_s8  ;;  %p711_p13 = scmp.lt.s32.totalorder %s705_s8, %s705_s8 }
  0x1d   :  { %p712_p0 = por %p711_p13, %p710_p12 }
  0x1f   :  { %p713_p1 = pnand %p712_p0, %p706_p11 }
  0x21   :  { %716 = shalt.err (!%p713_p1)
}
  0x22   :  { %s771_s1 = smov 128   ;;  %s772_s9 = smov 8  }
  0x23   :  { %22 = dma.hbm_to_vmem [thread:$0]  %s855_s0, 512, %s17_s27, [#allocation3], %s771_s1, %s771_s1, %s772_s9  }
  0x24   :  { %s773_s12 = smov [#allocation7]   ;;  %s717_s16 = scalar_lea.hbm %s857_s2, 1024 }
  0x25   :  { %s40_s13 = sshll.u32 %s773_s12, 4  ;;  %p718_p2 = scmp.ne.s32.totalorder %s857_s2, %s717_s16  ;;  %s41_s13 = int_to_ptr.vmem [resolvable:$true] %s40_s13 }
  0x26   :  { %p721_p3 = scmp.lt.u32.totalorder %s717_s16, %s857_s2 }
  0x28   :  { %p723_p4 = pnand %p721_p3, %p718_p2 }
  0x2a   :  { %726 = shalt.err (!%p723_p4)
}
  0x2b   :  { %s727_s21 = scalar_lea.vmem %s41_s13, 1024  ;;  %p732_p6 = scmp.lt.s32.totalorder %s41_s13, %s41_s13 }
  0x2c   :  { %p728_p5 = scmp.ne.s32.totalorder %s41_s13, %s727_s21  ;;  %p733_p7 = scmp.lt.s32.totalorder %s727_s21, %s727_s21 }
  0x2e   :  { %p734_p8 = por %p733_p7, %p732_p6 }
  0x30   :  { %p735_p9 = pnand %p734_p8, %p728_p5 }
  0x32   :  { %738 = shalt.err (!%p735_p9)
}
  0x33   :  { %46 = dma.hbm_to_vmem [thread:$0]  %s857_s2, 1024, %s41_s13, [#allocation6], %s768_s22, %s768_s22, %s769_s23  }
  0x34   :  { %761 = dma.done.wait [#allocation3], 512  }
  0x35   :  { %762 = vsyncadd [#allocation3], 4294966784 }
  0x36   :  { %763 = dma.done.wait [#allocation6], 2048  }
  0x37   :  { %764 = vsyncadd [#allocation6], 4294965248  ;;  %v657_v0 = vld [vmem:[#allocation7] sm:$0xff]   ;;  %v658_v1 = vld [vmem:[#allocation7 + $0x8] sm:$0xff]   ;;  %s774_s2 = smov [#allocation8]  }
  0x38   :  { %584 = vmatprep.subr.bf16.mxu0 %v657_v0  ;;  %v659_v2 = vld [vmem:[#allocation7 + $0x10] sm:$0xff]   ;;  %v660_v3 = vld [vmem:[#allocation7 + $0x18] sm:$0xff]   ;;  %v665_v4 = vld [vmem:[#allocation5] sm:$0xff]   ;;  %s523_s22 = sshll.u32 %s774_s2, 4  ;;  %s524_s22 = int_to_ptr.vmem [resolvable:$true] %s523_s22 }
  0x39   :  { %585 = vmatpush3.bf16.msra.mxu0 %v657_v0  ;;  %600 = vmatprep.mubr.bf16.mxu0 %v665_v4  ;;  %v661_v5 = vld [vmem:[#allocation7 + $0x20] sm:$0xff]   ;;  %v662_v6 = vld [vmem:[#allocation7 + $0x28] sm:$0xff]   ;;  %v663_v7 = vld [vmem:[#allocation7 + $0x30] sm:$0xff]   ;;  %s739_s23 = scalar_lea.vmem %s524_s22, 2048  ;;  %p744_p11 = scmp.lt.s32.totalorder %s524_s22, %s524_s22 }
  0x3a   :  { %586 = vmatprep.subr.bf16.mxu0 %v658_v1  ;;  %v664_v8 = vld [vmem:[#allocation7 + $0x38] sm:$0xff]   ;;  %v666_v9 = vld [vmem:[#allocation5 + $0x8] sm:$0xff]   ;;  %v667_v10 = vld [vmem:[#allocation5 + $0x10] sm:$0xff]   ;;  %p740_p10 = scmp.ne.s32.totalorder %s524_s22, %s739_s23  ;;  %p745_p12 = scmp.lt.s32.totalorder %s739_s23, %s739_s23 }
  0x3b   :  { %v668_v11 = vld [vmem:[#allocation5 + $0x18] sm:$0xff]   ;;  %v669_v12 = vld [vmem:[#allocation5 + $0x20] sm:$0xff]   ;;  %v670_v13 = vld [vmem:[#allocation5 + $0x28] sm:$0xff]  }
  0x3c   :  { %v671_v14 = vld [vmem:[#allocation5 + $0x30] sm:$0xff]   ;;  %v672_v15 = vld [vmem:[#allocation5 + $0x38] sm:$0xff]   ;;  %v318_v16 = vld [vmem:[#allocation2] sm:$0xff]  ;;  %p746_p13 = por %p745_p12, %p744_p11 }
  0x3d   :  { %587 = vmatpush3.bf16.msra.mxu0 %v658_v1  ;;  %v322_v17 = vunpack.c.l.s8.bf16 %v318_v16  ;;  %v319_v42 = vld [vmem:[#allocation2 + $0x8] sm:$0xff]  ;;  %v323_v43 = vunpack.c.h.s8.bf16 %v318_v16  ;;  %v320_v45 = vld [vmem:[#allocation2 + $0x10] sm:$0xff]  ;;  %v321_v48 = vld [vmem:[#allocation2 + $0x18] sm:$0xff] }
  0x3e   :  { %588 = vmatprep.subr.bf16.mxu0 %v659_v2  ;;  %v324_v44 = vunpack.c.l.s8.bf16 %v319_v42  ;;  %v325_v46 = vunpack.c.h.s8.bf16 %v319_v42  ;;  %v326_v47 = vunpack.c.l.s8.bf16 %v320_v45  ;;  %v327_v49 = vunpack.c.h.s8.bf16 %v320_v45  ;;  %p747_p0 = pnand %p746_p13, %p740_p10 }
  0x3f   :  { %632 = vmatprep.mubr.bf16.mxu1 %v322_v17  ;;  %v328_v50 = vunpack.c.l.s8.bf16 %v321_v48  ;;  %v329_v51 = vunpack.c.h.s8.bf16 %v321_v48 }
  0x41   :  { %589 = vmatpush3.bf16.msra.mxu0 %v659_v2 }
  0x42   :  { %590 = vmatprep.subr.bf16.mxu0 %v660_v3 }
  0x45   :  { %591 = vmatpush3.bf16.msra.mxu0 %v660_v3 }
  0x46   :  { %592 = vmatprep.subr.bf16.mxu0 %v661_v5 }
  0x49   :  { %593 = vmatpush3.bf16.msra.mxu0 %v661_v5 }
  0x4a   :  { %594 = vmatprep.subr.bf16.mxu0 %v662_v6 }
  0x4d   :  { %595 = vmatpush3.bf16.msra.mxu0 %v662_v6 }
  0x4e   :  { %596 = vmatprep.subr.bf16.mxu0 %v663_v7 }
  0x51   :  { %597 = vmatpush3.bf16.msra.mxu0 %v663_v7 }
  0x52   :  { %598 = vmatprep.subr.bf16.mxu0 %v664_v8 }
  0x55   :  { %599 = vmatpush3.bf16.msra.mxu0 %v664_v8 }
  0x58   :  { %601 = vmatmul.mubr.bf16.vlgmr.msra.gmra.mrb[0].mxu0 %v666_v9 }
  0x59   :  { %604 = vmatprep.mubr.bf16.mxu0 %v667_v10 }
  0x60   :  { %605 = vmatmul.mubr.bf16.gmra.mrb[4].mxu0 %v668_v11 }
  0x61   :  { %608 = vmatprep.mubr.bf16.mxu0 %v669_v12 }
  0x68   :  { %609 = vmatmul.mubr.bf16.gmra.mrb[8].mxu0 %v670_v13 }
  0x69   :  { %612 = vmatprep.mubr.bf16.mxu0 %v671_v14 }
  0x70   :  { %613 = vmatmul.mubr.bf16.gmra.mrb[12].mxu0 %v672_v15 }
 0x12b   :  { %v602_v18 = vpop.f32.mrb[0].mxu0 }
 0x12c   :  { %v239_v19 = vpop.f32.mrb[1].mxu0 }
 0x12d   :  { %v603_v20 = vpop.f32.mrb[2].mxu0 }
 0x12e   :  { %v331_v21 = vpack.c.bf16 %v603_v20, %v602_v18  ;;  %v242_v22 = vpop.f32.mrb[3].mxu0 }
 0x12f   :  { %v330_v23 = vpack.c.bf16 %v242_v22, %v239_v19 }
 0x131   :  { %616 = vmatprep.subr.bf16.mxu1 %v330_v23 }
 0x132   :  { %617 = vmatpush3.bf16.msra.mxu1 %v330_v23 }
 0x133   :  { %v606_v24 = vpop.f32.mrb[4].mxu0  ;;  %618 = vmatprep.subr.bf16.mxu1 %v331_v21 }
 0x134   :  { %v255_v25 = vpop.f32.mrb[5].mxu0 }
 0x135   :  { %v607_v26 = vpop.f32.mrb[6].mxu0 }
 0x136   :  { %v333_v27 = vpack.c.bf16 %v607_v26, %v606_v24  ;;  %v258_v28 = vpop.f32.mrb[7].mxu0  ;;  %619 = vmatpush3.bf16.msra.mxu1 %v331_v21 }
 0x137   :  { %v332_v29 = vpack.c.bf16 %v258_v28, %v255_v25 }
 0x139   :  { %620 = vmatprep.subr.bf16.mxu1 %v332_v29 }
 0x13a   :  { %621 = vmatpush3.bf16.msra.mxu1 %v332_v29 }
 0x13b   :  { %v610_v30 = vpop.f32.mrb[8].mxu0  ;;  %622 = vmatprep.subr.bf16.mxu1 %v333_v27 }
 0x13c   :  { %v271_v31 = vpop.f32.mrb[9].mxu0 }
 0x13d   :  { %v611_v32 = vpop.f32.mrb[10].mxu0 }
 0x13e   :  { %v335_v33 = vpack.c.bf16 %v611_v32, %v610_v30  ;;  %v274_v34 = vpop.f32.mrb[11].mxu0  ;;  %623 = vmatpush3.bf16.msra.mxu1 %v333_v27 }
 0x13f   :  { %v334_v35 = vpack.c.bf16 %v274_v34, %v271_v31 }
 0x141   :  { %624 = vmatprep.subr.bf16.mxu1 %v334_v35 }
 0x142   :  { %625 = vmatpush3.bf16.msra.mxu1 %v334_v35 }
 0x143   :  { %v614_v36 = vpop.f32.mrb[12].mxu0  ;;  %626 = vmatprep.subr.bf16.mxu1 %v335_v33 }
 0x144   :  { %v287_v37 = vpop.f32.mrb[13].mxu0 }
 0x145   :  { %v615_v38 = vpop.f32.mrb[14].mxu0 }
 0x146   :  { %v337_v39 = vpack.c.bf16 %v615_v38, %v614_v36  ;;  %v290_v40 = vpop.f32.mrb[15].mxu0  ;;  %627 = vmatpush3.bf16.msra.mxu1 %v335_v33 }
 0x147   :  { %v336_v41 = vpack.c.bf16 %v290_v40, %v287_v37 }
 0x149   :  { %628 = vmatprep.subr.bf16.mxu1 %v336_v41 }
 0x14a   :  { %629 = vmatpush3.bf16.msra.mxu1 %v336_v41 }
 0x14b   :  { %630 = vmatprep.subr.bf16.mxu1 %v337_v39 }
 0x14e   :  { %631 = vmatpush3.bf16.msra.mxu1 %v337_v39 }
 0x151   :  { %633 = vmatmul.mubr.bf16.vlgmr.msra.gmra.mrb[0].mxu1 %v323_v43 }
 0x152   :  { %636 = vmatprep.mubr.bf16.mxu1 %v324_v44 }
 0x159   :  { %637 = vmatmul.mubr.bf16.gmra.mrb[4].mxu1 %v325_v46 }
 0x15a   :  { %640 = vmatprep.mubr.bf16.mxu1 %v326_v47 }
 0x161   :  { %641 = vmatmul.mubr.bf16.gmra.mrb[8].mxu1 %v327_v49 }
 0x162   :  { %644 = vmatprep.mubr.bf16.mxu1 %v328_v50 }
 0x169   :  { %645 = vmatmul.mubr.bf16.gmra.mrb[12].mxu1 %v329_v51 }
 0x224   :  { %v634_v52 = vpop.f32.mrb[0].mxu1 }
 0x225   :  { %v372_v53 = vpop.f32.mrb[1].mxu1  ;;  %v488_v55 = vmax.f32 %v634_v52, 0.0 }
 0x226   :  { %v635_v54 = vpop.f32.mrb[2].mxu1  ;;  %v486_v57 = vmax.f32 %v372_v53, 0.0 }
 0x227   :  { %v375_v56 = vpop.f32.mrb[3].mxu1  ;;  %504 = vst [vmem:[#allocation8 + $0x10] sm:$0xff] %v488_v55  ;;  %v489_v58 = vmax.f32 %v635_v54, 0.0 }
 0x228   :  { %502 = vst [vmem:[#allocation8] sm:$0xff] %v486_v57  ;;  %v487_v59 = vmax.f32 %v375_v56, 0.0 }
 0x229   :  { %505 = vst [vmem:[#allocation8 + $0x18] sm:$0xff] %v489_v58 }
 0x22a   :  { %503 = vst [vmem:[#allocation8 + $0x8] sm:$0xff] %v487_v59 }
 0x22c   :  { %v638_v60 = vpop.f32.mrb[4].mxu1 }
 0x22d   :  { %v388_v61 = vpop.f32.mrb[5].mxu1  ;;  %v492_v63 = vmax.f32 %v638_v60, 0.0 }
 0x22e   :  { %v639_v62 = vpop.f32.mrb[6].mxu1  ;;  %v490_v1 = vmax.f32 %v388_v61, 0.0 }
 0x22f   :  { %v391_v0 = vpop.f32.mrb[7].mxu1  ;;  %508 = vst [vmem:[#allocation8 + $0x30] sm:$0xff] %v492_v63  ;;  %v493_v2 = vmax.f32 %v639_v62, 0.0 }
 0x230   :  { %506 = vst [vmem:[#allocation8 + $0x20] sm:$0xff] %v490_v1  ;;  %v491_v3 = vmax.f32 %v391_v0, 0.0 }
 0x231   :  { %509 = vst [vmem:[#allocation8 + $0x38] sm:$0xff] %v493_v2 }
 0x232   :  { %507 = vst [vmem:[#allocation8 + $0x28] sm:$0xff] %v491_v3 }
 0x234   :  { %v642_v4 = vpop.f32.mrb[8].mxu1 }
 0x235   :  { %v404_v5 = vpop.f32.mrb[9].mxu1  ;;  %v496_v7 = vmax.f32 %v642_v4, 0.0 }
 0x236   :  { %v643_v6 = vpop.f32.mrb[10].mxu1  ;;  %v494_v9 = vmax.f32 %v404_v5, 0.0 }
 0x237   :  { %v407_v8 = vpop.f32.mrb[11].mxu1  ;;  %512 = vst [vmem:[#allocation8 + $0x50] sm:$0xff] %v496_v7  ;;  %v497_v10 = vmax.f32 %v643_v6, 0.0 }
 0x238   :  { %510 = vst [vmem:[#allocation8 + $0x40] sm:$0xff] %v494_v9  ;;  %v495_v11 = vmax.f32 %v407_v8, 0.0 }
 0x239   :  { %513 = vst [vmem:[#allocation8 + $0x58] sm:$0xff] %v497_v10 }
 0x23a   :  { %511 = vst [vmem:[#allocation8 + $0x48] sm:$0xff] %v495_v11 }
 0x23c   :  { %v646_v12 = vpop.f32.mrb[12].mxu1 }
 0x23d   :  { %v420_v13 = vpop.f32.mrb[13].mxu1  ;;  %v500_v15 = vmax.f32 %v646_v12, 0.0 }
 0x23e   :  { %v647_v14 = vpop.f32.mrb[14].mxu1  ;;  %v498_v17 = vmax.f32 %v420_v13, 0.0 }
 0x23f   :  { %v423_v16 = vpop.f32.mrb[15].mxu1  ;;  %516 = vst [vmem:[#allocation8 + $0x70] sm:$0xff] %v500_v15  ;;  %v501_v18 = vmax.f32 %v647_v14, 0.0 }
 0x240   :  { %514 = vst [vmem:[#allocation8 + $0x60] sm:$0xff] %v498_v17  ;;  %v499_v19 = vmax.f32 %v423_v16, 0.0 }
 0x241   :  { %517 = vst [vmem:[#allocation8 + $0x78] sm:$0xff] %v501_v18 }
 0x242   :  { %515 = vst [vmem:[#allocation8 + $0x68] sm:$0xff] %v499_v19 }
 0x243   :  { %750 = shalt.err (!%p747_p0)
}
 0x244   :  { %s751_s27 = scalar_lea.hbm %s858_s3, 2048 }
 0x245   :  { %p752_p1 = scmp.ne.s32.totalorder %s858_s3, %s751_s27  ;;  %p755_p2 = scmp.lt.u32.totalorder %s751_s27, %s858_s3 }
 0x247   :  { %p757_p3 = pnand %p755_p2, %p752_p1 }
 0x249   :  { %760 = shalt.err (!%p757_p3)
}
 0x24a   :  { %529 = dma.vmem_to_hbm [thread:$0]  %s524_s22, 2048, %s858_s3, [#allocation4], %s771_s1, %s771_s1, %s772_s9  }
 0x24b   :  { %765 = dma.done.wait [#allocation4], 2048  }
 0x24c   :  { %766 = vsyncadd [#allocation4], 4294965248 }
 0x24d   :  { %533 = vsyncpa [#allocation3], 1 }
 0x24e   :  { %534 = vsyncpa [#allocation6], 1 }
 0x24f   :  { %535 = vsyncpa [#allocation4], 1 }

</bundles_post_ra>
